<compile_context>
chip_gen: v7x
topology: tpu7x:2x2x1
jax: 0.10.0
libtpu: 0.0.40
codegen_flags: <defaults>
</compile_context>

<pallas_src>
import functools

import numpy as np
import jax
import jax.numpy as jnp
from jax.experimental import pallas as pl
from jax.experimental.pallas import tpu as pltpu

IGNORE_LABEL = -1
THRESH = 0.7
MIN_KEPT = 100000        # module default (max(1, min_kept) applied in wrapper)
SB_WEIGHTS = 1.0         # stands in for config.LOSS.SB_WEIGHTS
MAX_TP = 32768           # max pixels (lanes) per grid step


def _round_up(x, m):
    return ((x + m - 1) // m) * m


def _vmem_capacity_bytes():
    try:
        cap = getattr(pltpu.get_tpu_info(), "vmem_capacity_bytes", None)
        if cap:
            return int(cap)
    except Exception:
        pass
    return 128 * 1024 * 1024      # v5e / v6e default


def _pick_tile(c, hw, itemsize):
    """Pixel-tile width (lanes): multiple of 128, as big as VMEM allows.

    Working-set model per grid step: 2x double-buffered score block + 2x
    target block + ~3 full-(C, tp) f32 in-kernel temporaries + 2x the
    (1,1,tp) f32 loss/prob output blocks (pass 2).  Budget is
    min(VMEM/4, 24 MiB) so v7x (64 MiB physical VMEM) gets a smaller cap
    than v5e/v6e (128 MiB) automatically.
    """
    budget = min(_vmem_capacity_bytes() // 4, 24 * 1024 * 1024)
    per_lane = 2 * (c * itemsize + 4) + 2 * (4 + 4) + 3 * c * 4
    tp = (budget // per_lane // 128) * 128
    tp = int(max(128, min(MAX_TP, tp)))
    return min(tp, _round_up(hw, 128))


def _mosaic_params():
    # Explicit VMEM limit comfortably above the working set (v5e/v6e: 64 MiB,
    # v7x: 32 MiB == its scoped default); both grid axes are independent.
    limit = min(_vmem_capacity_bytes() // 2, 64 * 1024 * 1024)
    return pltpu.CompilerParams(
        dimension_semantics=("parallel", "parallel"),
        vmem_limit_bytes=limit)


# ---------------------------------------------------------------------------
# Shared per-pixel math: classes on sublanes, pixels on lanes
# ---------------------------------------------------------------------------
def _per_pixel_math(score_ref, target_ref, *, ignore_label, hw, tp):
    x = score_ref[0]                                    # (C, TP) native dtype
    tgt = target_ref[0]                                 # (1, TP) int32

    # ragged spatial tail: mask lanes past H*W (no host-side padding)
    lane = jax.lax.broadcasted_iota(jnp.int32, tgt.shape, 1)
    in_bounds = (pl.program_id(1) * tp + lane) < hw
    valid = jnp.logical_and(in_bounds, tgt != ignore_label)
    safe_tgt = jnp.where(valid, tgt, 0)

    # subtract-max in the input dtype; ONE f32 shifted-logits temporary feeds
    # both the sum-exp reduce (sublane reduce -> lane dense) and the gather.
    mx = jnp.max(x, axis=0, keepdims=True)              # (1, TP)
    xs = (x - mx).astype(jnp.float32)                   # (C, TP) f32
    cls = jax.lax.broadcasted_iota(jnp.int32, xs.shape, 0)
    d_t = jnp.sum(jnp.where(cls == safe_tgt, xs, 0.0),
                  axis=0, keepdims=True)                # logit_t - max, (1, TP)
    lse_s = jnp.log(jnp.sum(jnp.exp(xs), axis=0, keepdims=True))
    loss = lse_s - d_t                                  # -log softmax[target]
    prob = jnp.exp(d_t - lse_s)                         # softmax prob of target
    return loss, prob, valid


# ---------------------------------------------------------------------------
# Pass 1: per-block partial reductions only (no per-pixel HBM output)
# ---------------------------------------------------------------------------
def _partials_kernel(score_ref, target_ref, cnt_ref, *, ignore_label, thresh,
                     hw, tp):
    loss, prob, valid = _per_pixel_math(score_ref, target_ref,
                                        ignore_label=ignore_label, hw=hw, tp=tp)
    kept = jnp.logical_and(valid, prob < thresh)   # keep-set when threshold==thresh
    n_valid = jnp.sum(valid.astype(jnp.float32))
    n_le = jnp.sum(jnp.logical_and(valid, prob <= thresh).astype(jnp.float32))
    n_kept = jnp.sum(kept.astype(jnp.float32))
    loss_kept = jnp.sum(jnp.where(kept, loss, 0.0))

    # partials packed into one (8, 128) tile (row 0, lanes 0..3):
    #   [0]=#valid  [1]=#(prob<=thresh)  [2]=#(prob<thresh)  [3]=sum kept loss
    r = jax.lax.broadcasted_iota(jnp.int32, (8, 128), 0)
    c = jax.lax.broadcasted_iota(jnp.int32, (8, 128), 1)
    row0 = r == 0
    cnt_ref[0] = jnp.where(row0 & (c == 0), n_valid,
                 jnp.where(row0 & (c == 1), n_le,
                 jnp.where(row0 & (c == 2), n_kept,
                 jnp.where(row0 & (c == 3), loss_kept, 0.0))))


# ---------------------------------------------------------------------------
# Pass 2 (rare path only): materialize per-pixel loss and target-class prob
# ---------------------------------------------------------------------------
def _loss_prob_kernel(score_ref, target_ref, loss_ref, prob_ref, *,
                      ignore_label, hw, tp):
    loss, prob, valid = _per_pixel_math(score_ref, target_ref,
                                        ignore_label=ignore_label, hw=hw, tp=tp)
    loss_ref[0] = jnp.where(valid, loss, 0.0)     # ignore_index -> 0 loss
    prob_ref[0] = jnp.where(valid, prob, 2.0)     # 2.0 == "never kept"


# ---------------------------------------------------------------------------
# Wrapper
# ---------------------------------------------------------------------------
def ohem_cross_entropy(score, target, *, ignore_label=IGNORE_LABEL,
                       thresh=THRESH, min_kept=MIN_KEPT,
                       sb_weights=SB_WEIGHTS):
    N, C, H, W = score.shape
    hw = H * W
    min_kept = max(1, int(min_kept))

    # metadata-only reshapes (no HBM copies); score keeps its native dtype
    score3 = score.reshape(N, C, hw)
    target3 = target.reshape(N, 1, hw).astype(jnp.int32)

    tp = _pick_tile(C, hw, jnp.dtype(score.dtype).itemsize)
    g_hw = pl.cdiv(hw, tp)
    grid = (N, g_hw)
    params = _mosaic_params()

    part_kernel = functools.partial(_partials_kernel, ignore_label=ignore_label,
                                    thresh=float(thresh), hw=hw, tp=tp)
    counts = pl.pallas_call(
        part_kernel,
        grid=grid,
        in_specs=[pl.BlockSpec((1, C, tp), lambda n, i: (n, 0, i)),
                  pl.BlockSpec((1, 1, tp), lambda n, i: (n, 0, i))],
        out_specs=pl.BlockSpec((1, 8, 128), lambda n, i: (n, i, 0)),
        out_shape=jax.ShapeDtypeStruct((N, g_hw * 8, 128), jnp.float32),
        compiler_params=params,
    )(score3, target3)

    part = counts.reshape(N, g_hw, 8, 128)[:, :, 0, :]
    # per-block values are exact integers in f32 (block <= 32768 px); cast to
    # int32 before the cross-block sum so totals stay exact past 2^24 pixels.
    m = jnp.sum(part[..., 0].astype(jnp.int32))           # num valid pixels
    c_le = jnp.sum(part[..., 1].astype(jnp.int32))        # #(valid & prob <= thresh)
    n_kept = jnp.sum(part[..., 2].astype(jnp.int32))      # #(valid & prob < thresh)
    loss_kept_sum = jnp.sum(part[..., 3])                  # sum loss over that set

    k = jnp.minimum(jnp.int32(min_kept), m - 1)
    thresh_f = jnp.float32(thresh)

    # Common case: >= k+1 valid probs are <= thresh  =>  k-th smallest <= thresh
    # => threshold == thresh exactly; the mean comes straight from the pass-1
    # partials and no per-pixel array ever touches HBM.
    def _common(_):
        return loss_kept_sum / n_kept.astype(jnp.float32)

    # Rare case: exact k-th smallest.  Materialize per-pixel loss/prob with a
    # second Pallas pass (same math as pass 1), then sort + thresholded mean.
    # TODO(synk): replace the sort with a histogram select fed from pass 1.
    def _rare(_):
        lp_kernel = functools.partial(_loss_prob_kernel,
                                      ignore_label=ignore_label, hw=hw, tp=tp)
        loss, prob = pl.pallas_call(
            lp_kernel,
            grid=grid,
            in_specs=[pl.BlockSpec((1, C, tp), lambda n, i: (n, 0, i)),
                      pl.BlockSpec((1, 1, tp), lambda n, i: (n, 0, i))],
            out_specs=[pl.BlockSpec((1, 1, tp), lambda n, i: (n, 0, i)),
                       pl.BlockSpec((1, 1, tp), lambda n, i: (n, 0, i))],
            out_shape=[jax.ShapeDtypeStruct((N, 1, hw), jnp.float32),
                       jax.ShapeDtypeStruct((N, 1, hw), jnp.float32)],
            compiler_params=params,
        )(score3, target3)
        loss = loss.reshape(-1)
        prob = prob.reshape(-1)
        key = jnp.where(prob <= 1.0, prob, jnp.inf)   # invalid (2.0) sorts last
        threshold = jnp.maximum(jnp.take(jnp.sort(key), k), thresh_f)
        keep = prob < threshold                       # invalid prob==2.0 never kept
        return (jnp.sum(jnp.where(keep, loss, 0.0))
                / jnp.sum(keep.astype(jnp.float32)))

    # Degenerate inputs (no valid / no kept pixels) yield NaN from 0/0, matching
    # the undefined behavior of the PyTorch original rather than crashing.
    mean_loss = jax.lax.cond(c_le >= k + 1, _common, _rare, 0)
    return sb_weights * mean_loss


# ---------------------------------------------------------------------------
# Pure-JAX reference (mirrors the PyTorch _ohem_forward math)
# ---------------------------------------------------------------------------
def _reference_ohem(score, target, ignore_label, thresh, min_kept, sb_weights):
    N, C, H, W = score.shape
    logits = jnp.transpose(score, (0, 2, 3, 1)).reshape(-1, C).astype(jnp.float32)
    tgt = target.reshape(-1)
    valid = tgt != ignore_label
    safe = jnp.where(valid, tgt, 0)
    lse = jax.scipy.special.logsumexp(logits, axis=1)
    logit_t = jnp.take_along_axis(logits, safe[:, None], axis=1)[:, 0]
    loss = jnp.where(valid, lse - logit_t, 0.0)
    prob = jnp.exp(logit_t - lse)
    sorted_probs = jnp.sort(jnp.where(valid, prob, jnp.inf))
    m = jnp.sum(valid).astype(jnp.int32)
    k = jnp.minimum(jnp.int32(max(1, min_kept)), m - 1)
    thr = jnp.maximum(jnp.take(sorted_probs, k), jnp.float32(thresh))
    keep = valid & (prob < thr)
    return sb_weights * (jnp.sum(jnp.where(keep, loss, 0.0)) / jnp.sum(keep))


if __name__ == "__main__":
    key = jax.random.PRNGKey(0)
    k1, k2, k3, k4, k5 = jax.random.split(key, 5)

    # --- Test 1: small NCHW batch with ignore pixels (common, no-sort path) ---
    N, C, H, W = 2, 8, 16, 16
    score = jax.random.normal(k1, (N, C, H, W), dtype=jnp.float32) * 2.0
    target = jax.random.randint(k2, (N, H, W), 0, C, dtype=jnp.int32)
    ignore_mask = jax.random.uniform(k3, (N, H, W)) < 0.1
    target = jnp.where(ignore_mask, IGNORE_LABEL, target)

    out = jax.block_until_ready(ohem_cross_entropy(score, target, min_kept=100))
    ref = _reference_ohem(score, target, IGNORE_LABEL, THRESH, 100, SB_WEIGHTS)
    assert np.allclose(np.asarray(out), np.asarray(ref),
                       rtol=1e-5, atol=1e-5), (float(out), float(ref))

    # --- Test 2: ragged spatial tail (H*W=195 not a multiple of 128) and
    # min_kept >= num_valid so the exact k-th-smallest fallback is exercised ---
    N2, C2, H2, W2 = 2, 19, 15, 13
    score2 = jax.random.normal(k4, (N2, C2, H2, W2), dtype=jnp.float32) * 2.0
    target2 = jax.random.randint(k5, (N2, H2, W2), 0, C2, dtype=jnp.int32)
    # force one confident pixel so the k-th smallest prob exceeds thresh
    score2 = score2.at[0, target2[0, 0, 0], 0, 0].add(25.0)

    out2 = jax.block_until_ready(
        ohem_cross_entropy(score2, target2, min_kept=100000))
    ref2 = _reference_ohem(score2, target2, IGNORE_LABEL, THRESH, 100000,
                           SB_WEIGHTS)
    assert np.allclose(np.asarray(out2), np.asarray(ref2),
                       rtol=1e-5, atol=1e-5), (float(out2), float(ref2))

    print("KERNEL_OK")
</pallas_src>

<mosaic_0001>
module attributes {stable_mosaic.version = 11 : i64} {
  func.func @_partials_kernel(%arg0: i32, %arg1: i32, %arg2: memref<1x8x256xf32, #tpu.memory_space<vmem>>, %arg3: memref<1x1x256xi32, #tpu.memory_space<vmem>>, %arg4: memref<1x8x128xf32, #tpu.memory_space<vmem>>) attributes {dimension_semantics = [#tpu.dimension_semantics<parallel>, #tpu.dimension_semantics<parallel>], iteration_bounds = array<i64: 2, 1>, scalar_prefetch = 0 : i64, scratch_operands = 0 : i64, tpu.core_type = #tpu.core_type<tc>, window_params = [{transform_indices = @transform_0, window_bounds = array<i64: 1, 8, 256>}, {transform_indices = @transform_1, window_bounds = array<i64: 1, 1, 256>}, {transform_indices = @transform_2, window_bounds = array<i64: 1, 8, 128>}]} {
    %c0 = arith.constant 0 : index
    %c0_0 = arith.constant 0 : index
    %c0_1 = arith.constant 0 : index
    %0 = vector.load %arg2[%c0, %c0_0, %c0_1] : memref<1x8x256xf32, #tpu.memory_space<vmem>>, vector<1x8x256xf32>
    %1 = vector.shape_cast %0 : vector<1x8x256xf32> to vector<8x256xf32>
    %c0_2 = arith.constant 0 : index
    %c0_3 = arith.constant 0 : index
    %c0_4 = arith.constant 0 : index
    %2 = vector.load %arg3[%c0_2, %c0_3, %c0_4] : memref<1x1x256xi32, #tpu.memory_space<vmem>>, vector<1x1x256xi32>
    %3 = vector.shape_cast %2 : vector<1x1x256xi32> to vector<1x256xi32>
    %4 = tpu.iota {dimensions = array<i32: 1>} : vector<1x256xi32>
    %c256_i32 = arith.constant 256 : i32
    %5 = arith.muli %arg1, %c256_i32 : i32
    %6 = vector.broadcast %5 : i32 to vector<1x256xi32>
    %7 = arith.addi %6, %4 : vector<1x256xi32>
    %c256_i32_5 = arith.constant 256 : i32
    %8 = vector.broadcast %c256_i32_5 : i32 to vector<1x256xi32>
    %9 = arith.cmpi slt, %7, %8 : vector<1x256xi32>
    %c-1_i32 = arith.constant -1 : i32
    %10 = vector.broadcast %c-1_i32 : i32 to vector<1x256xi32>
    %11 = arith.cmpi ne, %3, %10 : vector<1x256xi32>
    %12 = arith.andi %9, %11 : vector<1x256xi1>
    %c0_i32 = arith.constant 0 : i32
    %13 = vector.broadcast %c0_i32 : i32 to vector<1x256xi32>
    %14 = arith.select %12, %3, %13 : vector<1x256xi1>, vector<1x256xi32>
    %cst = arith.constant dense<0xFF800000> : vector<256xf32>
    %15 = vector.multi_reduction <maximumf>, %1, %cst [0] : vector<8x256xf32> to vector<256xf32>
    %16 = vector.shape_cast %15 : vector<256xf32> to vector<1x256xf32>
    %17 = vector.broadcast %16 : vector<1x256xf32> to vector<8x256xf32>
    %18 = arith.subf %1, %17 : vector<8x256xf32>
    %19 = tpu.iota {dimensions = array<i32: 0>} : vector<8x256xi32>
    %20 = vector.broadcast %14 : vector<1x256xi32> to vector<8x256xi32>
    %21 = arith.cmpi eq, %19, %20 : vector<8x256xi32>
    %cst_6 = arith.constant 0.000000e+00 : f32
    %22 = vector.broadcast %cst_6 : f32 to vector<8x256xf32>
    %23 = arith.select %21, %18, %22 : vector<8x256xi1>, vector<8x256xf32>
    %cst_7 = arith.constant dense<0.000000e+00> : vector<256xf32>
    %24 = vector.multi_reduction <add>, %23, %cst_7 [0] : vector<8x256xf32> to vector<256xf32>
    %25 = vector.shape_cast %24 : vector<256xf32> to vector<1x256xf32>
    %26 = math.exp %18 : vector<8x256xf32>
    %cst_8 = arith.constant dense<0.000000e+00> : vector<256xf32>
    %27 = vector.multi_reduction <add>, %26, %cst_8 [0] : vector<8x256xf32> to vector<256xf32>
    %28 = vector.shape_cast %27 : vector<256xf32> to vector<1x256xf32>
    %29 = math.log %28 : vector<1x256xf32>
    %30 = arith.subf %29, %25 : vector<1x256xf32>
    %31 = arith.subf %25, %29 : vector<1x256xf32>
    %32 = math.exp %31 : vector<1x256xf32>
    %cst_9 = arith.constant 0.699999988 : f32
    %33 = vector.broadcast %cst_9 : f32 to vector<1x256xf32>
    %34 = arith.cmpf olt, %32, %33 : vector<1x256xf32>
    %35 = arith.andi %12, %34 : vector<1x256xi1>
    %36 = arith.extui %12 : vector<1x256xi1> to vector<1x256xi32>
    %37 = arith.sitofp %36 : vector<1x256xi32> to vector<1x256xf32>
    %38 = vector.shape_cast %37 : vector<1x256xf32> to vector<1x1x256xf32>
    %cst_10 = arith.constant dense<0.000000e+00> : vector<1xf32>
    %39 = vector.multi_reduction <add>, %38, %cst_10 [1, 2] : vector<1x1x256xf32> to vector<1xf32>
    %40 = vector.shape_cast %39 : vector<1xf32> to vector<1x1x1xf32>
    %41 = vector.extract %40[0, 0, 0] : f32 from vector<1x1x1xf32>
    %cst_11 = arith.constant 0.699999988 : f32
    %42 = vector.broadcast %cst_11 : f32 to vector<1x256xf32>
    %43 = arith.cmpf ole, %32, %42 : vector<1x256xf32>
    %44 = arith.andi %12, %43 : vector<1x256xi1>
    %45 = arith.extui %44 : vector<1x256xi1> to vector<1x256xi32>
    %46 = arith.sitofp %45 : vector<1x256xi32> to vector<1x256xf32>
    %47 = vector.shape_cast %46 : vector<1x256xf32> to vector<1x1x256xf32>
    %cst_12 = arith.constant dense<0.000000e+00> : vector<1xf32>
    %48 = vector.multi_reduction <add>, %47, %cst_12 [1, 2] : vector<1x1x256xf32> to vector<1xf32>
    %49 = vector.shape_cast %48 : vector<1xf32> to vector<1x1x1xf32>
    %50 = vector.extract %49[0, 0, 0] : f32 from vector<1x1x1xf32>
    %51 = arith.extui %35 : vector<1x256xi1> to vector<1x256xi32>
    %52 = arith.sitofp %51 : vector<1x256xi32> to vector<1x256xf32>
    %53 = vector.shape_cast %52 : vector<1x256xf32> to vector<1x1x256xf32>
    %cst_13 = arith.constant dense<0.000000e+00> : vector<1xf32>
    %54 = vector.multi_reduction <add>, %53, %cst_13 [1, 2] : vector<1x1x256xf32> to vector<1xf32>
    %55 = vector.shape_cast %54 : vector<1xf32> to vector<1x1x1xf32>
    %56 = vector.extract %55[0, 0, 0] : f32 from vector<1x1x1xf32>
    %cst_14 = arith.constant 0.000000e+00 : f32
    %57 = vector.broadcast %cst_14 : f32 to vector<1x256xf32>
    %58 = arith.select %35, %30, %57 : vector<1x256xi1>, vector<1x256xf32>
    %59 = vector.shape_cast %58 : vector<1x256xf32> to vector<1x1x256xf32>
    %cst_15 = arith.constant dense<0.000000e+00> : vector<1xf32>
    %60 = vector.multi_reduction <add>, %59, %cst_15 [1, 2] : vector<1x1x256xf32> to vector<1xf32>
    %61 = vector.shape_cast %60 : vector<1xf32> to vector<1x1x1xf32>
    %62 = vector.extract %61[0, 0, 0] : f32 from vector<1x1x1xf32>
    %63 = tpu.iota {dimensions = array<i32: 0>} : vector<8x128xi32>
    %64 = tpu.iota {dimensions = array<i32: 1>} : vector<8x128xi32>
    %c0_i32_16 = arith.constant 0 : i32
    %65 = vector.broadcast %c0_i32_16 : i32 to vector<8x128xi32>
    %66 = arith.cmpi eq, %63, %65 : vector<8x128xi32>
    %c0_i32_17 = arith.constant 0 : i32
    %67 = vector.broadcast %c0_i32_17 : i32 to vector<8x128xi32>
    %68 = arith.cmpi eq, %64, %67 : vector<8x128xi32>
    %69 = arith.andi %66, %68 : vector<8x128xi1>
    %c1_i32 = arith.constant 1 : i32
    %70 = vector.broadcast %c1_i32 : i32 to vector<8x128xi32>
    %71 = arith.cmpi eq, %64, %70 : vector<8x128xi32>
    %72 = arith.andi %66, %71 : vector<8x128xi1>
    %c2_i32 = arith.constant 2 : i32
    %73 = vector.broadcast %c2_i32 : i32 to vector<8x128xi32>
    %74 = arith.cmpi eq, %64, %73 : vector<8x128xi32>
    %75 = arith.andi %66, %74 : vector<8x128xi1>
    %c3_i32 = arith.constant 3 : i32
    %76 = vector.broadcast %c3_i32 : i32 to vector<8x128xi32>
    %77 = arith.cmpi eq, %64, %76 : vector<8x128xi32>
    %78 = arith.andi %66, %77 : vector<8x128xi1>
    %cst_18 = arith.constant 0.000000e+00 : f32
    %79 = vector.broadcast %62 : f32 to vector<8x128xf32>
    %80 = vector.broadcast %cst_18 : f32 to vector<8x128xf32>
    %81 = arith.select %78, %79, %80 : vector<8x128xi1>, vector<8x128xf32>
    %82 = vector.broadcast %56 : f32 to vector<8x128xf32>
    %83 = arith.select %75, %82, %81 : vector<8x128xi1>, vector<8x128xf32>
    %84 = vector.broadcast %50 : f32 to vector<8x128xf32>
    %85 = arith.select %72, %84, %83 : vector<8x128xi1>, vector<8x128xf32>
    %86 = vector.broadcast %41 : f32 to vector<8x128xf32>
    %87 = arith.select %69, %86, %85 : vector<8x128xi1>, vector<8x128xf32>
    %c0_19 = arith.constant 0 : index
    %c0_20 = arith.constant 0 : index
    %c0_21 = arith.constant 0 : index
    %88 = vector.load %arg4[%c0_19, %c0_20, %c0_21] : memref<1x8x128xf32, #tpu.memory_space<vmem>>, vector<1x8x128xf32>
    %89 = vector.shape_cast %88 : vector<1x8x128xf32> to vector<8x128xf32>
    %90 = vector.shape_cast %87 : vector<8x128xf32> to vector<1x8x128xf32>
    tpu.vector_store %arg4[%c0_19, %c0_20, %c0_21], %90 {strides = array<i32>} : memref<1x8x128xf32, #tpu.memory_space<vmem>>, vector<1x8x128xf32>,
    return
  }
  func.func @transform_0(%arg0: i32, %arg1: i32) -> (i32, i32, i32) {
    %c0_i32 = arith.constant 0 : i32
    %c0_i32_0 = arith.constant 0 : i32
    return %arg0, %c0_i32, %arg1 : i32, i32, i32
  }
  func.func @transform_1(%arg0: i32, %arg1: i32) -> (i32, i32, i32) {
    %c0_i32 = arith.constant 0 : i32
    %c0_i32_0 = arith.constant 0 : i32
    return %arg0, %c0_i32, %arg1 : i32, i32, i32
  }
  func.func @transform_2(%arg0: i32, %arg1: i32) -> (i32, i32, i32) {
    %c0_i32 = arith.constant 0 : i32
    %c0_i32_0 = arith.constant 0 : i32
    return %arg0, %arg1, %c0_i32 : i32, i32, i32
  }
}

</mosaic_0001>

<bundles_post_ra>
// kernel: tpu_custom_call.1
= control target key start
LH: loop header
LB: loop body
LE: loop exit
PB: predicated region body
PF: predicated region fallthrough
CT: control target
= control target key end

     0   :  { %7 = vsyncpa [#allocation3], 0  ;;  %s1091_s0 = inlined_call_operand.hbm [shape: f32[2,8,256], index: 0, kind: input, shape index: {}]   ;;  %s1092_s1 = inlined_call_operand.hbm [shape: s32[2,1,256], index: 1, kind: input, shape index: {}]   ;;  %s1093_s2 = inlined_call_operand.hbm [shape: f32[2,8,128], index: 2, kind: output, shape index: {}]  }
   0x1   :  { %9 = vsyncpa [#allocation3 + $0x1], 0 }
   0x2   :  { %10 = vsyncpa [#allocation6], 0 }
   0x3   :  { %12 = vsyncpa [#allocation6 + $0x1], 0 }
   0x4   :  { %13 = vsyncpa [#allocation4], 0 }
   0x5   :  { %15 = vsyncpa [#allocation4 + $0x1], 0  ;;  %s821_s9 = smov 0   ;;  %s823_s10 = smov 0  }
   0x6   :  { %s825_s11 = smov 0   ;;  %s827_s12 = smov 0  }
   0x7   :  { %s829_s13 = smov 0   ;;  %s831_s14 = smov 0  }
   0x8 LB: > { %s538_s15 = sadd.s32 4294967295, %s799_s14   ;;  %s539_s16 = sadd.s32 4294967294, %s799_s14   ;;  %s799_s14 = sphi %s831_s14, %s21_s14   ;;  %s795_s13 = sphi %s829_s13, %s1115_s13   ;;  %s791_s12 = sphi %s827_s12, %s1114_s12   ;;  %s787_s11 = sphi %s825_s11, %s1113_s11   ;;  %s783_s10 = sphi %s823_s10, %s1112_s10   ;;  %s779_s9 = sphi %s821_s9, %s1111_s9  }
   0x9   : > { %s33_s17 = sadd.s32 1, %s795_s13  ;;  %s42_s18 = sadd.s32 1, %s787_s11 }
   0xa   : > { %p35_p0 = scmp.ge.s32.totalorder %s33_s17, 2  ;;  %p49_p1 = scmp.ne.s32.totalorder %s787_s11, %s783_s10 }
   0xb   : > { %p50_p2 = scmp.eq.s32.totalorder %s799_s14, 0  ;;  %p55_p3 = scmp.ne.s32.totalorder %s783_s10, %s779_s9 }
   0xc   : > { %s1117_s17 = smov (%p35_p0, %s33_s17), 0  ;;  %p56_p5 = scmp.eq.s32.totalorder %s538_s15, 0 }
   0xd   : > { %p862_p4 = por %p50_p2, %p49_p1  ;;  %s37_s20 = ssub.s32 %s795_s13, %s1117_s17 }
   0xe   : > { %p109_p6 = scmp.eq.s32.totalorder %s538_s15, 1  ;;  %p40_p7 = scmp.eq.s32.totalorder %s37_s20, 0 }
   0xf   : > { %p868_p8 = por %p56_p5, %p55_p3  ;;  %p115_p10 = scmp.eq.s32.totalorder %s539_s16, 1 }
  0x10   : > { %p872_p9 = por %p109_p6, %p49_p1  ;;  %p589_p13 = scmp.lt.s32.totalorder %s799_s14, 2 }
  0x11   : > { %s1097_s21 = scalar_select %p868_p8, 1, 0 }
  0x12   : > { %s1098_s22 = scalar_select %p872_p9, 1, 0 }
  0x13   : > { %s877_s23 = scalar_select %p40_p7, %s787_s11, %s42_s18  }
  0x14   : > { %p879_p11 = por %p115_p10, %p55_p3  ;;  %s886_s25 = sand.u32 1, %s787_s11  }
  0x15   : > { %s542_s26 = sshll.u32 %s886_s25, 4  ;;  %s562_s27 = sshll.u32 %s795_s13, 8 }
  0x16   : > { %s1099_s24 = scalar_select %p879_p11, 1, 0 }
  0x17   : > { %s893_s30 = scalar_lea.hbm %s1091_s0, %s562_s27  ;;  %s139_s3 = scalar_lea.vmem [#allocation2], %s542_s26 }
  0x18   : > { %s149_s4 = sshll.u32 %s139_s3, 4  ;;  %p899_p0 = pnand %p589_p13, %p862_p4  ;;  %s895_s4 = int_to_ptr.vmem [resolvable:$true] %s149_s4 }
  0x19   : > { %s136_s6 = scalar_lea.sflag [#allocation3], %s886_s25  ;;  %s653_s7 = scalar_lea.hbm %s893_s30, 256 }
  0x1a   : > { %p654_p3 = scmp.ne.s32.totalorder %s893_s30, %s653_s7  ;;  %p655_p5 = pneg %p899_p0 }
  0x1b   : > { %s658_s16 = scalar_lea.hbm %s1091_s0, 512  ;;  %p659_p4 = scmp.lt.u32.totalorder %s893_s30, %s1091_s0 }
  0x1c   : > { %p656_p6 = pnand %p655_p5, %p654_p3  ;;  %p660_p10 = scmp.lt.u32.totalorder %s658_s16, %s653_s7 }
  0x1d   : > { %p662_p12 = scmp.lt.u32.totalorder %s653_s7, %s893_s30 }
  0x1e   : > { %p657_p7 = pneg %p656_p6  ;;  %p661_p13 = por %p660_p10, %p659_p4 }
  0x20   : > { %p663_p1 = por %p662_p12, %p661_p13 }
  0x22   : > { %p664_p2 = pnand %p663_p1, %p657_p7 }
  0x24   : > { %667 = shalt.err (!%p664_p2)
}
  0x25   : > { %s668_s20 = scalar_lea.vmem %s895_s4, 256  ;;  %s801_s26 = smov [#allocation2]  }
  0x26   : > { %p669_p3 = scmp.ne.s32.totalorder %s895_s4, %s668_s20  ;;  %s673_s27 = sshll.u32 %s801_s26, 4  ;;  %s674_s27 = int_to_ptr.vmem [resolvable:$false] %s673_s27 }
  0x27   : > { %s675_s28 = scalar_lea.vmem %s674_s27, 512  ;;  %p676_p9 = scmp.lt.s32.totalorder %s895_s4, %s674_s27 }
  0x28   : > { %p671_p6 = pnand %p669_p3, %p655_p5  ;;  %p677_p4 = scmp.lt.s32.totalorder %s675_s28, %s668_s20 }
  0x2a   : > { %p672_p11 = pneg %p671_p6  ;;  %p678_p10 = por %p677_p4, %p676_p9 }
  0x2c   : > { %p679_p12 = pnand %p678_p10, %p672_p11 }
  0x2e   : > { %682 = shalt.err (!%p679_p12)
}
  0x2f   : > { %581 = dma.hbm_to_vmem [thread:$0]  (!%p899_p0), %s893_s30, 256, %s895_s4, %s136_s6  }
  0x30   : > { %p1101_p1 = scmp.lt.s32.totalorder %s799_s14, 3  ;;  %p1102_p2 = scmp.ge.s32.totalorder %s799_s14, 1 }
  0x31   : > { %s545_s3 = sshll.u32 %s886_s25, 1  ;;  %s563_s7 = sshll.u32 %s795_s13, 5 }
  0x32   : > { %p935_p7 = pnand %p1102_p2, %p1101_p1  ;;  %s944_s16 = scalar_lea.hbm %s1092_s1, %s563_s7 }
  0x33   : > { %s160_s18 = scalar_lea.vmem [#allocation5], %s545_s3  ;;  %s157_s30 = scalar_lea.sflag [#allocation6], %s886_s25 }
  0x34   : > { %s1103_s29 = scalar_select %p935_p7, 1, 0 }
  0x35   : > { %s170_s19 = sshll.u32 %s160_s18, 4  ;;  %s683_s4 = scalar_lea.hbm %s944_s16, 32  ;;  %s171_s19 = int_to_ptr.vmem [resolvable:$true] %s170_s19 }
  0x36   : > { %p684_p9 = scmp.ne.s32.totalorder %s944_s16, %s683_s4  ;;  %s688_s26 = scalar_lea.hbm %s1092_s1, 64 }
  0x37   : > { %p689_p3 = scmp.lt.u32.totalorder %s944_s16, %s1092_s1  ;;  %p690_p6 = scmp.lt.u32.totalorder %s688_s26, %s683_s4 }
  0x38   : > { %p686_p11 = pnand %p684_p9, %p655_p5  ;;  %p692_p10 = scmp.lt.u32.totalorder %s683_s4, %s944_s16 }
  0x39   : > { %p691_p4 = por %p690_p6, %p689_p3 }
  0x3a   : > { %p687_p13 = pneg %p686_p11 }
  0x3b   : > { %p693_p12 = por %p692_p10, %p691_p4 }
  0x3d   : > { %p694_p1 = pnand %p693_p12, %p687_p13 }
  0x3f   : > { %697 = shalt.err (!%p694_p1)
}
  0x40   : > { %s698_s25 = scalar_lea.vmem %s171_s19, 32  ;;  %s802_s3 = smov [#allocation5]  }
  0x41   : > { %p699_p2 = scmp.ne.s32.totalorder %s171_s19, %s698_s25  ;;  %s703_s7 = sshll.u32 %s802_s3, 4  ;;  %s704_s7 = int_to_ptr.vmem [resolvable:$false] %s703_s7 }
  0x42   : > { %s705_s8 = scalar_lea.vmem %s704_s7, 64  ;;  %p706_p8 = scmp.lt.s32.totalorder %s171_s19, %s704_s7 }
  0x43   : > { %p701_p9 = pnand %p699_p2, %p655_p5  ;;  %p707_p7 = scmp.lt.s32.totalorder %s705_s8, %s698_s25 }
  0x45   : > { %p702_p11 = pneg %p701_p9  ;;  %p708_p3 = por %p707_p7, %p706_p8 }
  0x47   : > { %p709_p6 = pnand %p708_p3, %p702_p11 }
  0x49   : > { %712 = shalt.err (!%p709_p6)
}
  0x4a   : > { %584 = dma.hbm_to_vmem [thread:$0]  (!%p899_p0), %s944_s16, 32, %s171_s19, %s157_s30  }
  0x4b   : > { %p1104_p13 = scmp.ne.s32.totalorder %s1103_s29, 0 }
  0x4c   : > { %s969_s15 = sand.u32 (!%p1104_p13), 1, %s783_s10   ;;  %p1105_p5 = scmp.ne.s32.totalorder (!%p1104_p13), %s1097_s21, 0 }
  0x4d   : > { %179 = sbr.rel (%p1104_p13) target bundleno = 393 (0x189), region = 28  ;;  %s549_s18 = sshll.u32 (!%p1104_p13), %s969_s15, 4 }
  0x4e   : > { %s182_s4 = scalar_lea.sflag (!%p1104_p13), [#allocation3], %s969_s15  ;;  %s185_s6 = scalar_lea.vmem (!%p1104_p13), [#allocation2], %s549_s18 }
  0x54   : > { %766 = dma.done.wait (%p1105_p5), %s182_s4, 256  }
  0x55   : > { %768 = vsyncadd (%p1105_p5), %s182_s4, 4294967040  ;;  %s550_s5 = sshll.u32 %s969_s15, 1  ;;  %s191_s29 = scalar_lea.sflag [#allocation6], %s969_s15 }
  0x56   : > { %s194_s16 = scalar_lea.vmem [#allocation5], %s550_s5 }
  0x57   : > { %770 = dma.done.wait (%p1105_p5), %s191_s29, 32  }
  0x58   : > { %772 = vsyncadd (%p1105_p5), %s191_s29, 4294967264  ;;  %v225_v0 = vlaneseq  ;;  %v224_v4 = vld [vmem:[%s194_s16] sm:$0x3]  ;;  %v223_v6 = vld [vmem:[%s185_s6 + $0x8] sm:$0xff]  ;;  %v803_v8 = vmov 0   ;;  %vm334_vm1 = vcmask 1040384  }
  0x59   : > { %v222_v5 = vld [vmem:[%s185_s6] sm:$0xff]  ;;  %vm234_vm0 = vcmp.ne.s32.totalorder %v224_v4, 4294967295  ;;  %v264_v10 = vrot.slane %v223_v6, 4  ;;  %v804_v17 = vmov 0.0   ;;  %s551_s21 = sshll.u32 %s969_s15, 3  ;;  %s559_s27 = sshll.u32 %s791_s12, 7 }
  0x5a   : > { %v984_v1 = vshrl.u32 %v225_v0, 7  ;;  %v258_v7 = vrot.slane %v222_v5, 4  ;;  %v235_v9 = vsel %vm234_vm0, 1, %v803_v8  ;;  %s219_s28 = scalar_lea.vmem [#allocation7], %s551_s21  ;;  %s1042_s8 = scalar_lea.hbm %s1093_s2, %s559_s27 }
  0x5b   : > { %v265_v14 = vmax.f32 %v223_v6, %v264_v10  ;;  %s430_s25 = sshll.u32 %s219_s28, 4  ;;  %s416_s12 = scalar_lea.sflag [#allocation4], %s969_s15  ;;  %s1044_s25 = int_to_ptr.vmem [resolvable:$true] %s430_s25 }
  0x5c   : > { %v238_v2 = vsub.s32 0, %v984_v1  ;;  %v242_v3 = vsub.s32 1, %v984_v1  ;;  %v259_v13 = vmax.f32 %v222_v5, %v258_v7  ;;  %vm397_vm14 = vcmp.eq.s32.totalorder %v984_v1, 0  ;;  %s713_s18 = scalar_lea.vmem %s1044_s25, 128  ;;  %p1108_p0 = scmp.ne.s32.totalorder %s1098_s22, 0 }
  0x5d   : > { %v266_v24 = vrot.slane %v265_v14, 2  ;;  %p714_p8 = scmp.ne.s32.totalorder %s1044_s25, %s713_s18  ;;  %s805_s4 = smov [#allocation7]  }
  0x5e   : > { %v239_v11 = vrot.slane %v235_v9, %v238_v2  ;;  %v988_v12 = vrot.slane %v235_v9, %v242_v3  ;;  %v260_v16 = vrot.slane %v259_v13, 2  ;;  %v251_v28 = vrot.slane %v224_v4, %v238_v2  ;;  %s717_s6 = sshll.u32 %s805_s4, 4  ;;  %s718_s6 = int_to_ptr.vmem [resolvable:$false] %s717_s6 }
  0x5f   : > { %v267_v26 = vmax.f32 %v265_v14, %v266_v24  ;;  %v255_v32 = vrot.slane %v224_v4, %v242_v3  ;;  %p715_p7 = pnand %p714_p8, %p1108_p0  ;;  %s719_s5 = scalar_lea.vmem %s718_s6, 256 }
  0x60   : > { %vm990_vm2 = vcmp.ne.s32.totalorder %v239_v11, 0  ;;  %vm245_vm3 = vcmp.ne.s32.totalorder %v988_v12, 0  ;;  %v261_v22 = vmax.f32 %v259_v13, %v260_v16  ;;  %p720_p10 = scmp.lt.s32.totalorder %s1044_s25, %s718_s6  ;;  %p721_p12 = scmp.lt.s32.totalorder %s719_s5, %s713_s18 }
  0x61   : > { %v552_v18 = vsel %vm990_vm2, 1.0, %v804_v17  ;;  %v553_v19 = vsel %vm245_vm3, 1.0, %v804_v17  ;;  %v268_v29 = vrot.slane %v267_v26, 1  ;;  %v256_v34 = vsel %vm990_vm2, %v251_v28, 0  ;;  %p716_p4 = pneg %p715_p7 }
  0x62   : > { %v335_v20 = vsel %vm334_vm1, %v552_v18, 0.0  ;;  %v336_v21 = vsel %vm334_vm1, %v553_v19, 0.0  ;;  %v262_v25 = vrot.slane %v261_v22, 1  ;;  %v257_v37 = vsel %vm245_vm3, %v255_v32, 0  ;;  %p722_p1 = por %p721_p12, %p720_p10 }
  0x63   : > { %v337_v23 = vadd.f32 %v336_v21, %v335_v20  ;;  %v269_v31 = vmax.f32 %v267_v26, %v268_v29  ;;  %v277_v38 = vrot.slane %v256_v34, %v238_v2  ;;  %v281_v39 = vrot.slane %v257_v37, %v238_v2 }
  0x64   : > { %v263_v27 = vmax.f32 %v261_v22, %v262_v25  ;;  %p723_p2 = pnand %p722_p1, %p716_p4 }
  0x65   : > { %338 = vadd.xlane.f32.xlu0 %v337_v23  ;;  %v271_v35 = vsub.f32 %v223_v6, %v269_v31  ;;  %vm282_vm4 = vcmp.eq.s32.totalorder %v984_v1, %v277_v38  ;;  %vm283_vm5 = vcmp.eq.s32.totalorder %v984_v1, %v281_v39 }
  0x66   : > { %v270_v30 = vsub.f32 %v222_v5, %v263_v27 }
  0x67   : > { %v300_v36 = vmul.f32 1.442695, %v271_v35  ;;  %v285_v43 = vsel %vm283_vm5, %v271_v35, 0.0 }
  0x68   : > { %v298_v33 = vmul.f32 1.442695, %v270_v30  ;;  %v284_v40 = vsel %vm282_vm4, %v270_v30, 0.0  ;;  %v292_v48 = vrot.slane %v285_v43, 4 }
  0x69   : > { %v286_v44 = vrot.slane %v284_v40, 4 }
  0x6a   : > { %641 = vpow2.f32 %v298_v33  ;;  %v293_v54 = vadd.f32 %v292_v48, %v285_v43 }
  0x6b   : > { %643 = vpow2.f32 %v300_v36  ;;  %v287_v50 = vadd.f32 %v286_v44, %v284_v40 }
  0x6c   : > { %v294_v60 = vrot.slane %v293_v54, 2 }
  0x6d   : > { %v288_v56 = vrot.slane %v287_v50, 2 }
  0x6e   : > { %v295_v63 = vadd.f32 %v294_v60, %v293_v54 }
  0x6f   : > { %v289_v61 = vadd.f32 %v288_v56, %v287_v50 }
  0x70   : > { %v296_v3 = vrot.slane %v295_v63, 1 }
  0x71   : > { %v290_v2 = vrot.slane %v289_v61, 1 }
  0x72   : > { %v297_v7 = vadd.f32 %v296_v3, %v295_v63 }
  0x73   : > { %v291_v4 = vadd.f32 %v290_v2, %v289_v61  ;;  %v226_v61 = vand.u32 127, %v225_v0 }
  0x74   : > { %v642_v41 = vpop.eup %641 }
  0x75   : > { %v302_v42 = vrot.slane %v642_v41, 4  ;;  %v644_v45 = vpop.eup %643  ;;  %vm404_vm15 = vcmp.eq.s32.totalorder %v226_v61, 3  ;;  %vm402_vm0 = vcmp.eq.s32.totalorder %v226_v61, 2 }
  0x76   : > { %v308_v47 = vrot.slane %v644_v45, 4  ;;  %vm403_vm4 = vmand %vm397_vm14, %vm402_vm0 }
  0x77   : > { %v303_v46 = vadd.f32 %v642_v41, %v302_v42 }
  0x78   : > { %v309_v51 = vadd.f32 %v644_v45, %v308_v47 }
  0x79   : > { %v304_v49 = vrot.slane %v303_v46, 2 }
  0x7a   : > { %v310_v53 = vrot.slane %v309_v51, 2 }
  0x7b   : > { %v305_v52 = vadd.f32 %v304_v49, %v303_v46 }
  0x7c   : > { %v311_v57 = vadd.f32 %v310_v53, %v309_v51 }
  0x7d   : > { %v306_v55 = vrot.slane %v305_v52, 1 }
  0x7e   : > { %v312_v59 = vrot.slane %v311_v57, 1 }
  0x7f   : > { %v307_v58 = vadd.f32 %v306_v55, %v305_v52 }
  0x80   : > { %v313_v62 = vadd.f32 %v312_v59, %v311_v57 }
  0x81   : > { %645 = vlog2.f32 %v307_v58 }
  0x82   : > { %647 = vlog2.f32 %v313_v62 }
  0x8b   : > { %v646_v5 = vpop.eup %645 }
  0x8c   : > { %v315_v6 = vmul.f32 0.6931472, %v646_v5  ;;  %v648_v8 = vpop.eup %647 }
  0x8d   : > { %v317_v10 = vmul.f32 0.6931472, %v648_v8 }
  0x8e   : > { %v320_v9 = vsub.f32 %v291_v4, %v315_v6  ;;  %v318_v18 = vsub.f32 %v315_v6, %v291_v4 }
  0x8f   : > { %v321_v13 = vsub.f32 %v297_v7, %v317_v10  ;;  %v319_v21 = vsub.f32 %v317_v10, %v297_v7 }
  0x90   : > { %v322_v11 = vmul.f32 1.442695, %v320_v9 }
  0x91   : > { %v324_v14 = vmul.f32 1.442695, %v321_v13 }
  0x92   : > { %649 = vpow2.f32 %v322_v11 }
  0x93   : > { %651 = vpow2.f32 %v324_v14 }
  0x9c   : > { %v650_v16 = vpop.eup %649 }
  0x9d   : > { %vm347_vm6 = vcmp.le.f32.partialorder %v650_v16, 0.7  ;;  %vm326_vm7 = vcmp.lt.f32.partialorder %v650_v16, 0.7  ;;  %v652_v19 = vpop.eup %651 }
  0x9e   : > { %vm349_vm8 = vmand %vm990_vm2, %vm347_vm6  ;;  %vm348_vm10 = vcmp.le.f32.partialorder %v652_v19, 0.7  ;;  %vm327_vm11 = vcmp.lt.f32.partialorder %v652_v19, 0.7 }
  0x9f   : > { %v554_v20 = vsel %vm349_vm8, 1.0, %v804_v17  ;;  %vm328_vm9 = vmand %vm990_vm2, %vm326_vm7  ;;  %vm398_vm2 = vcmp.eq.s32.totalorder %v226_v61, 0 }
  0xa0   : > { %v556_v22 = vsel %vm328_vm9, 1.0, %v804_v17  ;;  %vm350_vm12 = vmand %vm245_vm3, %vm348_vm10  ;;  %v355_v23 = vsel %vm334_vm1, %v554_v20, 0.0  ;;  %v383_v24 = vsel %vm328_vm9, %v318_v18, 0.0 }
  0xa1   : > { %v555_v25 = vsel %vm350_vm12, 1.0, %v804_v17  ;;  %vm329_vm13 = vmand %vm245_vm3, %vm327_vm11  ;;  %v371_v26 = vsel %vm334_vm1, %v556_v22, 0.0  ;;  %v385_v31 = vsel %vm334_vm1, %v383_v24, 0.0 }
  0xa2   : > { %v356_v15 = vsel %vm334_vm1, %v555_v25, 0.0  ;;  %v557_v27 = vsel %vm329_vm13, 1.0, %v804_v17  ;;  %v384_v28 = vsel %vm329_vm13, %v319_v21, 0.0  ;;  %vm405_vm3 = vmand %vm397_vm14, %vm404_vm15 }
  0xa3   : > { %v357_v29 = vadd.f32 %v356_v15, %v355_v23  ;;  %v372_v30 = vsel %vm334_vm1, %v557_v27, 0.0  ;;  %v386_v32 = vsel %vm334_vm1, %v384_v28, 0.0  ;;  %vm400_vm1 = vcmp.eq.s32.totalorder %v226_v61, 1  ;;  %vm399_vm6 = vmand %vm397_vm14, %vm398_vm2 }
  0xa4   : > { %v373_v33 = vadd.f32 %v372_v30, %v371_v26  ;;  %v387_v34 = vadd.f32 %v386_v32, %v385_v31  ;;  %vm401_vm5 = vmand %vm397_vm14, %vm400_vm1 }
  0xa5   : > { %358 = vadd.xlane.f32.xlu0 %v357_v29 }
  0xa6   : > { %374 = vadd.xlane.f32.xlu1 %v373_v33 }
  0xaa   : > { %388 = vadd.xlane.f32.xlu1 %v387_v34 }
  0xf2   : > { %v339_v12 = vpop.xlane.xlu0 %338 }
  0xf3   : > { %v340_v35 = vrot.slane %v339_v12, 4 }
  0xf5   : > { %v341_v36 = vadd.f32 %v340_v35, %v339_v12 }
  0xf7   : > { %v342_v37 = vrot.slane %v341_v36, 2 }
  0xf9   : > { %v343_v38 = vadd.f32 %v342_v37, %v341_v36 }
  0xfb   : > { %v344_v39 = vrot.slane %v343_v38, 1 }
  0xfd   : > { %v345_v17 = vadd.f32 %v344_v39, %v343_v38 }
  0xff   : > { %564 = vpush %v345_v17 }
 0x130   : > { %s565_s19 = spop %564 }
 0x131   : > { %v412_v4 = vstv %s565_s19 }
 0x132   : > { %v359_v40 = vpop.xlane.xlu0 %358 }
 0x133   : > { %v360_v41 = vrot.slane %v359_v40, 4  ;;  %v375_v42 = vpop.xlane.xlu1 %374 }
 0x134   : > { %v376_v43 = vrot.slane %v375_v42, 4 }
 0x135   : > { %v361_v44 = vadd.f32 %v360_v41, %v359_v40 }
 0x136   : > { %v377_v45 = vadd.f32 %v376_v43, %v375_v42 }
 0x137   : > { %v362_v46 = vrot.slane %v361_v44, 2  ;;  %v389_v47 = vpop.xlane.xlu1 %388 }
 0x138   : > { %v378_v48 = vrot.slane %v377_v45, 2  ;;  %v390_v49 = vrot.slane %v389_v47, 4 }
 0x139   : > { %v363_v50 = vadd.f32 %v362_v46, %v361_v44 }
 0x13a   : > { %v391_v51 = vadd.f32 %v390_v49, %v389_v47  ;;  %v379_v52 = vadd.f32 %v378_v48, %v377_v45 }
 0x13b   : > { %v364_v53 = vrot.slane %v363_v50, 1 }
 0x13c   : > { %v392_v54 = vrot.slane %v391_v51, 2  ;;  %v380_v55 = vrot.slane %v379_v52, 1 }
 0x13d   : > { %v365_v56 = vadd.f32 %v364_v53, %v363_v50 }
 0x13e   : > { %v393_v57 = vadd.f32 %v392_v54, %v391_v51  ;;  %v381_v58 = vadd.f32 %v380_v55, %v379_v52 }
 0x13f   : > { %566 = vpush %v365_v56 }
 0x140   : > { %568 = vpush %v381_v58  ;;  %v394_v59 = vrot.slane %v393_v57, 1 }
 0x142   : > { %v395_v60 = vadd.f32 %v394_v59, %v393_v57 }
 0x144   : > { %570 = vpush %v395_v60 }
 0x170   : > { %s567_s30 = spop %566 }
 0x171   : > { %s569_s20 = spop %568  ;;  %v410_v2 = vstv %s567_s30 }
 0x172   : > { %v408_v62 = vstv %s569_s20 }
 0x175   : > { %s571_s26 = spop %570 }
 0x176   : > { %v406_v0 = vstv %s571_s26 }
 0x177   : > { %v407_v63 = vsel %vm405_vm3, %v406_v0, 0.0 }
 0x178   : > { %v409_v3 = vsel %vm403_vm4, %v408_v62, %v407_v63 }
 0x179   : > { %v411_v5 = vsel %vm401_vm5, %v410_v2, %v409_v3 }
 0x17a   : > { %v413_v6 = vsel %vm399_vm6, %v412_v4, %v411_v5 }
 0x17b   : > { %414 = vst [vmem:[%s219_s28] sm:$0xff] %v413_v6 }
 0x17c   : > { %726 = shalt.err (!%p723_p2)
}
 0x17d   : > { %s727_s15 = scalar_lea.hbm %s1042_s8, 128  ;;  %s731_s21 = scalar_lea.hbm %s1093_s2, 256 }
 0x17e   : > { %p728_p9 = scmp.ne.s32.totalorder %s1042_s8, %s727_s15  ;;  %p732_p6 = scmp.lt.u32.totalorder %s1042_s8, %s1093_s2 }
 0x17f   : > { %p733_p13 = scmp.lt.u32.totalorder %s731_s21, %s727_s15  ;;  %p735_p8 = scmp.lt.u32.totalorder %s727_s15, %s1042_s8 }
 0x180   : > { %p729_p11 = pnand %p728_p9, %p1108_p0 }
 0x181   : > { %p734_p5 = por %p733_p13, %p732_p6 }
 0x182   : > { %p730_p3 = pneg %p729_p11 }
 0x183   : > { %p736_p7 = por %p735_p8, %p734_p5 }
 0x185   : > { %p737_p4 = pnand %p736_p7, %p730_p3 }
 0x187   : > { %740 = shalt.err (!%p737_p4)
}
 0x188   : > { %576 = dma.vmem_to_hbm [thread:$0]  (%p1108_p0), %s1044_s25, 128, %s1042_s8, %s416_s12  }
 0x189 PF: > { %s442_s20 = sand.u32 1, %s779_s9   ;;  %p1109_p10 = scmp.ne.s32.totalorder %s1099_s24, 0 }
 0x18a   : > { %p1110_p12 = scmp.ge.s32.totalorder %s799_s14, 2  ;;  %s443_s26 = scalar_lea.sflag [#allocation4], %s442_s20 }
 0x18c   : > { %p586_p1 = pnand %p1110_p12, %p1109_p10 }
 0x18e   : > { %774 = dma.done.wait (!%p586_p1), %s443_s26, 128  }
 0x18f   : > { %776 = vsyncadd (!%p586_p1), %s443_s26, 4294967168  ;;  %s21_s14 = sadd.s32 1, %s799_s14   ;;  %s1111_s9 = smov %s783_s10 }
 0x190   : > { %p18_p2 = scmp.ge.s32.totalorder %s21_s14, 4   ;;  %s1112_s10 = smov %s787_s11 }
 0x191   : > { %s1113_s11 = smov %s877_s23  ;;  %s1114_s12 = smov %s795_s13 }
 0x192   : > { %s1115_s13 = smov %s1117_s17  ;;  %20 = sbr.rel (!%p18_p2) target bundleno = 8 (0x8), region = 86 }
 0x199   :  { %448 = vsyncpa [#allocation3], 1 }
 0x19a   :  { %450 = vsyncpa [#allocation3 + $0x1], 1 }
 0x19b   :  { %451 = vsyncpa [#allocation6], 1 }
 0x19c   :  { %453 = vsyncpa [#allocation6 + $0x1], 1 }
 0x19d   :  { %454 = vsyncpa [#allocation4], 1 }
 0x19e   :  { %456 = vsyncpa [#allocation4 + $0x1], 1 }

</bundles_post_ra>
